<compile_context>
chip_gen: v7x
topology: tpu7x:2x2x1
jax: 0.10.0
libtpu: 0.0.40
codegen_flags: <defaults>
</compile_context>

<pallas_src>
import jax
import jax.numpy as jnp
from jax.experimental import pallas as pl
from jax.experimental.pallas import tpu as pltpu

_MIB = 1024 * 1024


def _add_pe_kernel(x_ref, pe_ref, o_ref):
    # x_ref : (rows, D2) tile of the flattened (B*S2, D2) input
    # pe_ref: (rows, D2) pre-replicated positional encodings (constant block)
    # o_ref : (rows, D2)
    o_ref[...] = x_ref[...] + pe_ref[...]


def _chip_config():
    """Returns (target block bytes, vmem_limit_bytes, prefer_split)."""
    vmem_bytes = None
    try:
        vmem_bytes = int(getattr(pltpu.get_tpu_info(),
                                 "vmem_capacity_bytes", 0)) or None
    except Exception:
        vmem_bytes = None
    kind = ""
    try:
        kind = jax.devices()[0].device_kind.lower()
    except Exception:
        pass
    is_v7x = ("7" in kind) or (vmem_bytes is not None and vmem_bytes <= 64 * _MIB)
    if is_v7x:
        # 64 MiB VMEM per core, 2 TensorCores: smaller blocks, split the grid
        # so both cores pull HBM bandwidth; explicit VMEM budget with
        # headroom for double-buffered in/out blocks.
        return 4 * _MIB, 28 * _MIB, True
    # v5e / v6e: 128 MiB VMEM, single TensorCore -> biggest blocks, no split.
    return 12 * _MIB, 64 * _MIB, False


def _choose_batch_tile(B, S2, per_batch_bytes, target_bytes, prefer_split,
                       min_split_bytes=256 * 1024):
    """Pick bt (batch elements per block).

    Keeps bt a divisor of B, the block under `target_bytes`, and the block
    row count (bt*S2) a multiple of 8 unless the block spans the whole array
    (which is always a legal block shape)."""
    divisors = [d for d in range(1, B + 1) if B % d == 0]

    def rows_ok(d):
        return (d * S2) % 8 == 0 or d == B

    fitting = [d for d in divisors
               if d * per_batch_bytes <= target_bytes and rows_ok(d)]
    if not fitting:
        return B  # whole array in one block (full-extent block is always legal)
    bt = max(fitting)
    if prefer_split and B // bt == 1 and B >= 2:
        # v7x only: give both TensorCores work, but never split into tiny blocks.
        split = [d for d in fitting
                 if B // d >= 2 and d * per_batch_bytes >= min_split_bytes]
        if split:
            bt = max(split)
    return bt


def positional_encoder_forward(x, pe):
    """x: (B, S, D), pe: (S_max, D) with S <= S_max.  Returns x + pe[:S]."""
    B, S, D = x.shape
    if S > pe.shape[0]:
        raise ValueError(
            f"seq_len {S} exceeds positional table rows {pe.shape[0]}")
    pe_s = pe[:S, :].astype(x.dtype)        # static slice + dtype match (glue)

    # ---- lane-dense folding: make the last dim a multiple of 128 ----
    if D < 128 and 128 % D == 0:
        fold = 128 // D
    else:
        fold = 1
        # TODO(synk): D neither divides nor is a multiple of 128 -> stores
        # stay lane-masked for that (non-default) configuration.
    S_pad = pl.cdiv(S, fold) * fold
    if S_pad != S:                          # odd S (e.g. the module's 51)
        x = jnp.pad(x, ((0, 0), (0, S_pad - S), (0, 0)))
        pe_s = jnp.pad(pe_s, ((0, S_pad - S), (0, 0)))
    S2, D2 = S_pad // fold, D * fold

    # ---- collapse (batch, folded-seq) into one dense row axis ----
    x_rows = x.reshape(B * S2, D2)

    itemsize = jnp.dtype(x.dtype).itemsize
    per_batch_bytes = S2 * D2 * itemsize
    target_bytes, vmem_limit, prefer_split = _chip_config()
    bt = _choose_batch_tile(B, S2, per_batch_bytes, target_bytes, prefer_split)
    rows = bt * S2
    grid = (B // bt,)

    # pe replicated once (wrapper-side XLA) to exactly one row-block; its
    # BlockSpec index is constant so it is DMA'd into VMEM a single time.
    pe_rows = jnp.tile(pe_s.reshape(S2, D2), (bt, 1))

    flops = B * S_pad * D                                     # one add / element
    bytes_accessed = (2 * B * S2 + rows) * D2 * itemsize      # read x, read pe, write out

    out_rows = pl.pallas_call(
        _add_pe_kernel,
        out_shape=jax.ShapeDtypeStruct((B * S2, D2), x.dtype),
        grid_spec=pl.GridSpec(
            grid=grid,
            in_specs=[
                pl.BlockSpec((rows, D2), lambda b: (b, 0)),
                pl.BlockSpec((rows, D2), lambda b: (0, 0)),   # constant block
            ],
            out_specs=pl.BlockSpec((rows, D2), lambda b: (b, 0)),
        ),
        compiler_params=pltpu.CompilerParams(
            dimension_semantics=("parallel",),
            vmem_limit_bytes=vmem_limit,
        ),
        cost_estimate=pl.CostEstimate(
            flops=flops, transcendentals=0, bytes_accessed=bytes_accessed),
    )(x_rows, pe_rows)

    out = out_rows.reshape(B, S_pad, D)
    return out[:, :S, :] if S_pad != S else out


if __name__ == "__main__":
    SEQ_LEN_MAX = 51   # module: pe has 51 rows
    LEN_WORD = 64      # module default lenWord=64
    B, S = 2, 8        # small example: batch=2, seq=8

    key = jax.random.PRNGKey(0)
    k_pe, k_x = jax.random.split(key)

    # Deterministic parameter init matching torch: uniform_(0.0, 1.0)
    pe = jax.random.uniform(k_pe, (SEQ_LEN_MAX, LEN_WORD), dtype=jnp.float32,
                            minval=0.0, maxval=1.0)
    x = jax.random.normal(k_x, (B, S, LEN_WORD), dtype=jnp.float32)

    out = positional_encoder_forward(x, pe)
    out = jax.block_until_ready(out)

    ref = x + pe[:S, :]
    assert out.shape == (B, S, LEN_WORD)
    assert jnp.allclose(out, ref, atol=1e-6), "mismatch vs reference"

    # Also exercise the odd-seq_len (padding) path used by the real module.
    x_full = jax.random.normal(k_x, (B, SEQ_LEN_MAX, LEN_WORD), dtype=jnp.float32)
    out_full = jax.block_until_ready(positional_encoder_forward(x_full, pe))
    ref_full = x_full + pe[:SEQ_LEN_MAX, :]
    assert out_full.shape == (B, SEQ_LEN_MAX, LEN_WORD)
    assert jnp.allclose(out_full, ref_full, atol=1e-6), "mismatch (odd seq_len)"

    print("KERNEL_OK")
</pallas_src>

<mosaic_0001>
module attributes {stable_mosaic.version = 11 : i64} {
  func.func @_add_pe_kernel(%arg0: i32, %arg1: memref<8x128xf32, #tpu.memory_space<vmem>>, %arg2: memref<8x128xf32, #tpu.memory_space<vmem>>, %arg3: memref<8x128xf32, #tpu.memory_space<vmem>>) attributes {dimension_semantics = [#tpu.dimension_semantics<parallel>], iteration_bounds = array<i64: 1>, scalar_prefetch = 0 : i64, scratch_operands = 0 : i64, tpu.core_type = #tpu.core_type<tc>, window_params = [{transform_indices = @transform_0, window_bounds = array<i64: 8, 128>}, {pipeline_mode = #tpu.pipeline_mode<synchronous>, transform_indices = @transform_1, window_bounds = array<i64: 8, 128>}, {transform_indices = @transform_2, window_bounds = array<i64: 8, 128>}]} {
    %c0 = arith.constant 0 : index
    %c0_0 = arith.constant 0 : index
    %0 = vector.load %arg1[%c0, %c0_0] : memref<8x128xf32, #tpu.memory_space<vmem>>, vector<8x128xf32>
    %c0_1 = arith.constant 0 : index
    %c0_2 = arith.constant 0 : index
    %1 = vector.load %arg2[%c0_1, %c0_2] : memref<8x128xf32, #tpu.memory_space<vmem>>, vector<8x128xf32>
    %2 = arith.addf %0, %1 : vector<8x128xf32>
    %c0_3 = arith.constant 0 : index
    %c0_4 = arith.constant 0 : index
    %3 = vector.load %arg3[%c0_3, %c0_4] : memref<8x128xf32, #tpu.memory_space<vmem>>, vector<8x128xf32>
    tpu.vector_store %arg3[%c0_3, %c0_4], %2 {strides = array<i32>} : memref<8x128xf32, #tpu.memory_space<vmem>>, vector<8x128xf32>,
    return
  }
  func.func @transform_0(%arg0: i32) -> (i32, i32) {
    %c0_i32 = arith.constant 0 : i32
    %c0_i32_0 = arith.constant 0 : i32
    return %arg0, %c0_i32 : i32, i32
  }
  func.func @transform_1(%arg0: i32) -> (i32, i32) {
    %c0_i32 = arith.constant 0 : i32
    %c0_i32_0 = arith.constant 0 : i32
    %c0_i32_1 = arith.constant 0 : i32
    return %c0_i32, %c0_i32_0 : i32, i32
  }
  func.func @transform_2(%arg0: i32) -> (i32, i32) {
    %c0_i32 = arith.constant 0 : i32
    %c0_i32_0 = arith.constant 0 : i32
    return %arg0, %c0_i32 : i32, i32
  }
}

</mosaic_0001>

<bundles_post_ra>
// kernel: tpu_custom_call.1
= control target key start
LH: loop header
LB: loop body
LE: loop exit
PB: predicated region body
PF: predicated region fallthrough
CT: control target
= control target key end

     0   :  { %7 = vsyncpa [#allocation3], 0  ;;  %s185_s0 = inlined_call_operand.hbm [shape: f32[8,128], index: 0, kind: input, shape index: {}]   ;;  %s186_s1 = inlined_call_operand.hbm [shape: f32[8,128], index: 1, kind: input, shape index: {}]   ;;  %s187_s2 = inlined_call_operand.hbm [shape: f32[8,128], index: 2, kind: output, shape index: {}]  }
   0x1   :  { %8 = vsyncpa [#allocation6], 0 }
   0x2   :  { %9 = vsyncpa [#allocation4], 0  ;;  %s131_s9 = smov [#allocation2]   ;;  %s132_s11 = smov [#allocation5]  }
   0x3   :  { %s16_s10 = sshll.u32 %s131_s9, 4  ;;  %s26_s12 = sshll.u32 %s132_s11, 4  ;;  %s17_s10 = int_to_ptr.vmem [resolvable:$true] %s16_s10  ;;  %s27_s12 = int_to_ptr.vmem [resolvable:$true] %s26_s12 }
   0x4   :  { %s59_s15 = scalar_lea.hbm %s185_s0, 128 }
   0x5   :  { %p60_p0 = scmp.ne.s32.totalorder %s185_s0, %s59_s15  ;;  %p63_p1 = scmp.lt.u32.totalorder %s59_s15, %s185_s0 }
   0x7   :  { %p65_p2 = pnand %p63_p1, %p60_p0 }
   0x9   :  { %68 = shalt.err (!%p65_p2)
}
   0xa   :  { %s69_s20 = scalar_lea.vmem %s17_s10, 128  ;;  %p74_p4 = scmp.lt.s32.totalorder %s17_s10, %s17_s10 }
   0xb   :  { %p70_p3 = scmp.ne.s32.totalorder %s17_s10, %s69_s20  ;;  %p75_p5 = scmp.lt.s32.totalorder %s69_s20, %s69_s20 }
   0xd   :  { %p76_p6 = por %p75_p5, %p74_p4 }
   0xf   :  { %p77_p7 = pnand %p76_p6, %p70_p3 }
  0x11   :  { %80 = shalt.err (!%p77_p7)
}
  0x12   :  { %19 = dma.hbm_to_vmem [thread:$0]  %s185_s0, 128, %s17_s10, [#allocation3]  }
  0x13   :  { %s81_s25 = scalar_lea.hbm %s186_s1, 128 }
  0x14   :  { %p82_p8 = scmp.ne.s32.totalorder %s186_s1, %s81_s25  ;;  %p85_p9 = scmp.lt.u32.totalorder %s81_s25, %s186_s1 }
  0x16   :  { %p87_p10 = pnand %p85_p9, %p82_p8 }
  0x18   :  { %90 = shalt.err (!%p87_p10)
}
  0x19   :  { %s91_s30 = scalar_lea.vmem %s27_s12, 128  ;;  %p96_p12 = scmp.lt.s32.totalorder %s27_s12, %s27_s12 }
  0x1a   :  { %p92_p11 = scmp.ne.s32.totalorder %s27_s12, %s91_s30  ;;  %p97_p13 = scmp.lt.s32.totalorder %s91_s30, %s91_s30 }
  0x1c   :  { %p98_p0 = por %p97_p13, %p96_p12 }
  0x1e   :  { %p99_p1 = pnand %p98_p0, %p92_p11 }
  0x20   :  { %102 = shalt.err (!%p99_p1)
}
  0x21   :  { %29 = dma.hbm_to_vmem [thread:$0]  %s186_s1, 128, %s27_s12, [#allocation6]  }
  0x22   :  { %125 = dma.done.wait [#allocation3], 128  }
  0x23   :  { %126 = vsyncadd [#allocation3], 4294967168 }
  0x24   :  { %127 = dma.done.wait [#allocation6], 128  }
  0x25   :  { %128 = vsyncadd [#allocation6], 4294967168  ;;  %s133_s4 = smov [#allocation7]   ;;  %v36_v0 = vld [vmem:[#allocation2] sm:$0xff]  ;;  %v37_v1 = vld [vmem:[#allocation5] sm:$0xff] }
  0x26   :  { %s46_s5 = sshll.u32 %s133_s4, 4  ;;  %v38_v2 = vadd.f32 %v37_v1, %v36_v0  ;;  %s47_s5 = int_to_ptr.vmem [resolvable:$true] %s46_s5 }
  0x27   :  { %s103_s6 = scalar_lea.vmem %s47_s5, 128  ;;  %p108_p3 = scmp.lt.s32.totalorder %s47_s5, %s47_s5 }
  0x28   :  { %39 = vst [vmem:[#allocation7] sm:$0xff] %v38_v2  ;;  %p104_p2 = scmp.ne.s32.totalorder %s47_s5, %s103_s6  ;;  %p109_p4 = scmp.lt.s32.totalorder %s103_s6, %s103_s6 }
  0x2a   :  { %p110_p5 = por %p109_p4, %p108_p3 }
  0x2c   :  { %p111_p6 = pnand %p110_p5, %p104_p2 }
  0x2e   :  { %114 = shalt.err (!%p111_p6)
}
  0x2f   :  { %s115_s8 = scalar_lea.hbm %s187_s2, 128 }
  0x30   :  { %p116_p7 = scmp.ne.s32.totalorder %s187_s2, %s115_s8  ;;  %p119_p8 = scmp.lt.u32.totalorder %s115_s8, %s187_s2 }
  0x32   :  { %p121_p9 = pnand %p119_p8, %p116_p7 }
  0x34   :  { %124 = shalt.err (!%p121_p9)
}
  0x35   :  { %49 = dma.vmem_to_hbm [thread:$0]  %s47_s5, 128, %s187_s2, [#allocation4]  }
  0x36   :  { %129 = dma.done.wait [#allocation4], 128  }
  0x37   :  { %130 = vsyncadd [#allocation4], 4294967168 }
  0x38   :  { %53 = vsyncpa [#allocation3], 1 }
  0x39   :  { %54 = vsyncpa [#allocation6], 1 }
  0x3a   :  { %55 = vsyncpa [#allocation4], 1 }

</bundles_post_ra>
